<compile_context>
chip_gen: v7x
topology: tpu7x:2x2x1
jax: 0.10.0
libtpu: 0.0.40
codegen_flags: <defaults>
</compile_context>

<pallas_src>
import functools

import jax
import jax.numpy as jnp
from jax.experimental import pallas as pl
from jax.experimental.pallas import tpu as pltpu


# ----------------------------------------------------------------------------
# Single fused Pallas kernel: whole VAE forward pass
# ----------------------------------------------------------------------------
def _vae_fused_kernel(con_ref, sti_ref, eps_con2_ref, eps_sty_ref,
                      cw1_ref, cb1_ref, cwh_ref, cbh_ref,
                      sw1_ref, sb1_ref, swh_ref, sbh_ref,
                      dw1_ref, db1_ref, dw2_ref, db2_ref,
                      dec_ref, con_stats_ref, sty_stats_ref,
                      z_con_ref, z_sty_ref, *, L):
    f32 = jnp.float32

    # ---- content encoder, batched over stack([con, sti]) -> (2B, G) --------
    x2 = jnp.concatenate([con_ref[...], sti_ref[...]], axis=0)          # (2B, G)
    h_c = jnp.dot(x2, cw1_ref[...], preferred_element_type=f32) + cb1_ref[...]
    h_c = jnp.maximum(h_c, 0.0)                                          # relu
    stats_c = jnp.dot(h_c, cwh_ref[...], preferred_element_type=f32) + cbh_ref[...]
    mu_c = stats_c[:, :L]                                                # (2B, L)
    lv_c = stats_c[:, L:]
    # reparameterization epilogue (exp() goes to the EUP slot)
    z_c = mu_c + jnp.exp(0.5 * lv_c) * eps_con2_ref[...]                 # (2B, L)

    # ---- style encoder on sti -> (B, G) -------------------------------------
    h_s = jnp.dot(sti_ref[...], sw1_ref[...], preferred_element_type=f32) + sb1_ref[...]
    h_s = jnp.maximum(h_s, 0.0)
    stats_s = jnp.dot(h_s, swh_ref[...], preferred_element_type=f32) + sbh_ref[...]
    mu_s = stats_s[:, :L]                                                # (B, L)
    lv_s = stats_s[:, L:]
    z_s = mu_s + jnp.exp(0.5 * lv_s) * eps_sty_ref[...]                  # (B, L)

    # ---- decoder, batched over the two latent concatenations -> (2B, 2L) ----
    # rows 0:B  -> cat(z_con,     z_sty)  -> con_output
    # rows B:2B -> cat(z_con_sti, z_sty)  -> sti_output
    z_s2 = jnp.concatenate([z_s, z_s], axis=0)                           # (2B, L)
    dec_in = jnp.concatenate([z_c, z_s2], axis=-1)                       # (2B, 2L)
    h_d = jnp.dot(dec_in, dw1_ref[...], preferred_element_type=f32) + db1_ref[...]
    h_d = jnp.maximum(h_d, 0.0)
    dec = jnp.dot(h_d, dw2_ref[...], preferred_element_type=f32) + db2_ref[...]

    # ---- outputs (lane-dense where it matters: dec / stats are 128 lanes) ---
    dec_ref[...] = dec
    con_stats_ref[...] = stats_c
    sty_stats_ref[...] = stats_s
    z_con_ref[...] = z_c
    z_sty_ref[...] = z_s


def vae_forward_fused(params, con, sti, eps_con2, eps_sty):
    """One pallas_call for the whole forward pass. All operands resident in VMEM."""
    B, G = con.shape
    L = params["con_head"][0].shape[1] // 2

    vmem = pl.BlockSpec(memory_space=pltpu.MemorySpace.VMEM)
    kernel = functools.partial(_vae_fused_kernel, L=L)

    out_shape = (
        jax.ShapeDtypeStruct((2 * B, G), jnp.float32),       # decoder outputs (stacked)
        jax.ShapeDtypeStruct((2 * B, 2 * L), jnp.float32),   # con mu|logvar (stacked)
        jax.ShapeDtypeStruct((B, 2 * L), jnp.float32),       # sty mu|logvar
        jax.ShapeDtypeStruct((2 * B, L), jnp.float32),       # z_con, z_con_sti (stacked)
        jax.ShapeDtypeStruct((B, L), jnp.float32),           # z_sty
    )

    return pl.pallas_call(
        kernel,
        out_shape=out_shape,
        in_specs=[vmem] * 16,
        out_specs=(vmem,) * 5,
    )(con, sti, eps_con2, eps_sty,
      *params["con_fc1"], *params["con_head"],
      *params["sty_fc1"], *params["sty_head"],
      *params["dec_fc1"], *params["dec_fc2"])


# ----------------------------------------------------------------------------
# Parameters & high-level forward (glue only; all math is inside the kernel)
# ----------------------------------------------------------------------------
def init_params(key, G, H, L):
    """mu/logvar heads are fused into a single (H, 2L) matrix per encoder."""
    def dense(k, din, dout):
        w = jax.random.normal(k, (din, dout), jnp.float32) * 0.02
        b = jnp.zeros((1, dout), jnp.float32)
        return w, b

    keys = jax.random.split(key, 6)
    return {
        "con_fc1": dense(keys[0], G, H),
        "con_head": dense(keys[1], H, 2 * L),   # [:, :L] = mu, [:, L:] = logvar
        "sty_fc1": dense(keys[2], G, H),
        "sty_head": dense(keys[3], H, 2 * L),
        "dec_fc1": dense(keys[4], 2 * L, H),
        "dec_fc2": dense(keys[5], H, G),
    }


def vae_forward(params, con, sti, key):
    """Equivalent of `self.outs = self.model(self.con, self.sti)`."""
    B = con.shape[0]
    L = params["con_head"][0].shape[1] // 2

    k1, k2, k3 = jax.random.split(key, 3)
    eps_con = jax.random.normal(k1, (B, L), jnp.float32)
    eps_sty = jax.random.normal(k2, (B, L), jnp.float32)
    eps_con_sti = jax.random.normal(k3, (B, L), jnp.float32)
    eps_con2 = jnp.concatenate([eps_con, eps_con_sti], axis=0)   # (2B, L)

    dec, con_stats, sty_stats, z_con_all, z_sty = vae_forward_fused(
        params, con, sti, eps_con2, eps_sty)

    con_output, sti_output = dec[:B], dec[B:]
    con_mu, con_lv = con_stats[:B, :L], con_stats[:B, L:]
    sty_mu, sty_lv = sty_stats[:, :L], sty_stats[:, L:]
    z_con = z_con_all[:B]

    return {
        "decoder": (con_output, sti_output),
        "con_latent": (z_con, con_mu, con_lv),
        "sty_latent": (z_sty, sty_mu, sty_lv),
    }


def compute_loss(outs, sti):
    """MSELoss(con_output, sti) + MSELoss(sti_output, sti)."""
    con_output, sti_output = outs["decoder"]
    return jnp.mean((con_output - sti) ** 2) + jnp.mean((sti_output - sti) ** 2)


# ----------------------------------------------------------------------------
# Pure-JAX reference (for a correctness sanity check against the fused kernel)
# ----------------------------------------------------------------------------
def _ref_forward(params, con, sti, key):
    hi = jax.lax.Precision.HIGHEST
    L = params["con_head"][0].shape[1] // 2
    B = con.shape[0]

    def enc(pfx, x):
        w1, b1 = params[f"{pfx}_fc1"]
        wh, bh = params[f"{pfx}_head"]
        h = jax.nn.relu(jnp.dot(x, w1, precision=hi) + b1)
        s = jnp.dot(h, wh, precision=hi) + bh
        return s[:, :L], s[:, L:]

    def dec(z):
        w1, b1 = params["dec_fc1"]
        w2, b2 = params["dec_fc2"]
        h = jax.nn.relu(jnp.dot(z, w1, precision=hi) + b1)
        return jnp.dot(h, w2, precision=hi) + b2

    k1, k2, k3 = jax.random.split(key, 3)
    e1 = jax.random.normal(k1, (B, L), jnp.float32)
    e2 = jax.random.normal(k2, (B, L), jnp.float32)
    e3 = jax.random.normal(k3, (B, L), jnp.float32)

    cmu, clv = enc("con", con)
    smu, slv = enc("sty", sti)
    csmu, cslv = enc("con", sti)
    z_con = cmu + jnp.exp(0.5 * clv) * e1
    z_sty = smu + jnp.exp(0.5 * slv) * e2
    z_cs = csmu + jnp.exp(0.5 * cslv) * e3
    return (dec(jnp.concatenate([z_con, z_sty], -1)),
            dec(jnp.concatenate([z_cs, z_sty], -1)))


# ----------------------------------------------------------------------------
# Demo
# ----------------------------------------------------------------------------
if __name__ == "__main__":
    # batch, genes, hidden, latent — lane-dense (G = H = 2L = 128)
    B, G, H, L = 8, 128, 128, 64

    root = jax.random.PRNGKey(0)
    k_params, k_sti, k_con, k_noise = jax.random.split(root, 4)

    params = init_params(k_params, G, H, L)

    # set_input: (b, c, g) -> (b, g) with c == 1
    sti = jax.random.normal(k_sti, (B, 1, G), jnp.float32).reshape(B, G)
    con = jax.random.normal(k_con, (B, 1, G), jnp.float32).reshape(B, G)

    outs = vae_forward(params, con, sti, k_noise)
    loss = compute_loss(outs, sti)

    jax.block_until_ready(outs["decoder"])
    jax.block_until_ready(loss)

    con_out, sti_out = outs["decoder"]
    assert con_out.shape == (B, G) and sti_out.shape == (B, G)

    # sanity check against the pure-JAX reference (same eps via same key splits)
    ref_con, ref_sti = _ref_forward(params, con, sti, k_noise)
    assert jnp.allclose(con_out, ref_con, rtol=1e-2, atol=1e-3)
    assert jnp.allclose(sti_out, ref_sti, rtol=1e-2, atol=1e-3)

    print("KERNEL_OK")
</pallas_src>

<mosaic_0001>
module attributes {stable_mosaic.version = 11 : i64} {
  func.func @_vae_fused_kernel(%arg0: memref<8x128xf32, #tpu.memory_space<vmem>>, %arg1: memref<8x128xf32, #tpu.memory_space<vmem>>, %arg2: memref<16x64xf32, #tpu.memory_space<vmem>>, %arg3: memref<8x64xf32, #tpu.memory_space<vmem>>, %arg4: memref<128x128xf32, #tpu.memory_space<vmem>>, %arg5: memref<1x128xf32, #tpu.memory_space<vmem>>, %arg6: memref<128x128xf32, #tpu.memory_space<vmem>>, %arg7: memref<1x128xf32, #tpu.memory_space<vmem>>, %arg8: memref<128x128xf32, #tpu.memory_space<vmem>>, %arg9: memref<1x128xf32, #tpu.memory_space<vmem>>, %arg10: memref<128x128xf32, #tpu.memory_space<vmem>>, %arg11: memref<1x128xf32, #tpu.memory_space<vmem>>, %arg12: memref<128x128xf32, #tpu.memory_space<vmem>>, %arg13: memref<1x128xf32, #tpu.memory_space<vmem>>, %arg14: memref<128x128xf32, #tpu.memory_space<vmem>>, %arg15: memref<1x128xf32, #tpu.memory_space<vmem>>, %arg16: memref<16x128xf32, #tpu.memory_space<vmem>>, %arg17: memref<16x128xf32, #tpu.memory_space<vmem>>, %arg18: memref<8x128xf32, #tpu.memory_space<vmem>>, %arg19: memref<16x64xf32, #tpu.memory_space<vmem>>, %arg20: memref<8x64xf32, #tpu.memory_space<vmem>>) attributes {dimension_semantics = [], scalar_prefetch = 0 : i64, scratch_operands = 0 : i64, tpu.core_type = #tpu.core_type<tc>} {
    %c0 = arith.constant 0 : index
    %c0_0 = arith.constant 0 : index
    %0 = vector.load %arg0[%c0, %c0_0] : memref<8x128xf32, #tpu.memory_space<vmem>>, vector<8x128xf32>
    %c0_1 = arith.constant 0 : index
    %c0_2 = arith.constant 0 : index
    %1 = vector.load %arg1[%c0_1, %c0_2] : memref<8x128xf32, #tpu.memory_space<vmem>>, vector<8x128xf32>
    %2 = tpu.concatenate %0, %1 in 0 : vector<8x128xf32>, vector<8x128xf32> -> vector<16x128xf32>
    %c0_3 = arith.constant 0 : index
    %c0_4 = arith.constant 0 : index
    %3 = vector.load %arg4[%c0_3, %c0_4] : memref<128x128xf32, #tpu.memory_space<vmem>>, vector<128x128xf32>
    %cst = arith.constant dense<0.000000e+00> : vector<16x128xf32>
    %4 = tpu.matmul %2, %3, %cst {dimension_numbers = #tpu.dot_dimension_numbers<[1], [0], [0], [1], [0, 0, 1, 1], [], []>} : vector<16x128xf32>, vector<128x128xf32>, vector<16x128xf32> -> vector<16x128xf32>
    %c0_5 = arith.constant 0 : index
    %c0_6 = arith.constant 0 : index
    %5 = vector.load %arg5[%c0_5, %c0_6] : memref<1x128xf32, #tpu.memory_space<vmem>>, vector<1x128xf32>
    %6 = vector.broadcast %5 : vector<1x128xf32> to vector<16x128xf32>
    %7 = arith.addf %4, %6 : vector<16x128xf32>
    %cst_7 = arith.constant 0.000000e+00 : f32
    %8 = vector.broadcast %cst_7 : f32 to vector<16x128xf32>
    %9 = arith.maximumf %7, %8 : vector<16x128xf32>
    %c0_8 = arith.constant 0 : index
    %c0_9 = arith.constant 0 : index
    %10 = vector.load %arg6[%c0_8, %c0_9] : memref<128x128xf32, #tpu.memory_space<vmem>>, vector<128x128xf32>
    %cst_10 = arith.constant dense<0.000000e+00> : vector<16x128xf32>
    %11 = tpu.matmul %9, %10, %cst_10 {dimension_numbers = #tpu.dot_dimension_numbers<[1], [0], [0], [1], [0, 0, 1, 1], [], []>} : vector<16x128xf32>, vector<128x128xf32>, vector<16x128xf32> -> vector<16x128xf32>
    %c0_11 = arith.constant 0 : index
    %c0_12 = arith.constant 0 : index
    %12 = vector.load %arg7[%c0_11, %c0_12] : memref<1x128xf32, #tpu.memory_space<vmem>>, vector<1x128xf32>
    %13 = vector.broadcast %12 : vector<1x128xf32> to vector<16x128xf32>
    %14 = arith.addf %11, %13 : vector<16x128xf32>
    %15 = vector.extract_strided_slice %14 {offsets = [0, 0], sizes = [16, 64], strides = [1, 1]} : vector<16x128xf32> to vector<16x64xf32>
    %16 = vector.extract_strided_slice %14 {offsets = [0, 64], sizes = [16, 64], strides = [1, 1]} : vector<16x128xf32> to vector<16x64xf32>
    %cst_13 = arith.constant 5.000000e-01 : f32
    %17 = vector.broadcast %cst_13 : f32 to vector<16x64xf32>
    %18 = arith.mulf %17, %16 : vector<16x64xf32>
    %19 = math.exp %18 : vector<16x64xf32>
    %c0_14 = arith.constant 0 : index
    %c0_15 = arith.constant 0 : index
    %20 = vector.load %arg2[%c0_14, %c0_15] : memref<16x64xf32, #tpu.memory_space<vmem>>, vector<16x64xf32>
    %21 = arith.mulf %19, %20 : vector<16x64xf32>
    %22 = arith.addf %15, %21 : vector<16x64xf32>
    %c0_16 = arith.constant 0 : index
    %c0_17 = arith.constant 0 : index
    %23 = vector.load %arg1[%c0_16, %c0_17] : memref<8x128xf32, #tpu.memory_space<vmem>>, vector<8x128xf32>
    %c0_18 = arith.constant 0 : index
    %c0_19 = arith.constant 0 : index
    %24 = vector.load %arg8[%c0_18, %c0_19] : memref<128x128xf32, #tpu.memory_space<vmem>>, vector<128x128xf32>
    %cst_20 = arith.constant dense<0.000000e+00> : vector<8x128xf32>
    %25 = tpu.matmul %23, %24, %cst_20 {dimension_numbers = #tpu.dot_dimension_numbers<[1], [0], [0], [1], [0, 0, 1, 1], [], []>} : vector<8x128xf32>, vector<128x128xf32>, vector<8x128xf32> -> vector<8x128xf32>
    %c0_21 = arith.constant 0 : index
    %c0_22 = arith.constant 0 : index
    %26 = vector.load %arg9[%c0_21, %c0_22] : memref<1x128xf32, #tpu.memory_space<vmem>>, vector<1x128xf32>
    %27 = vector.broadcast %26 : vector<1x128xf32> to vector<8x128xf32>
    %28 = arith.addf %25, %27 : vector<8x128xf32>
    %cst_23 = arith.constant 0.000000e+00 : f32
    %29 = vector.broadcast %cst_23 : f32 to vector<8x128xf32>
    %30 = arith.maximumf %28, %29 : vector<8x128xf32>
    %c0_24 = arith.constant 0 : index
    %c0_25 = arith.constant 0 : index
    %31 = vector.load %arg10[%c0_24, %c0_25] : memref<128x128xf32, #tpu.memory_space<vmem>>, vector<128x128xf32>
    %cst_26 = arith.constant dense<0.000000e+00> : vector<8x128xf32>
    %32 = tpu.matmul %30, %31, %cst_26 {dimension_numbers = #tpu.dot_dimension_numbers<[1], [0], [0], [1], [0, 0, 1, 1], [], []>} : vector<8x128xf32>, vector<128x128xf32>, vector<8x128xf32> -> vector<8x128xf32>
    %c0_27 = arith.constant 0 : index
    %c0_28 = arith.constant 0 : index
    %33 = vector.load %arg11[%c0_27, %c0_28] : memref<1x128xf32, #tpu.memory_space<vmem>>, vector<1x128xf32>
    %34 = vector.broadcast %33 : vector<1x128xf32> to vector<8x128xf32>
    %35 = arith.addf %32, %34 : vector<8x128xf32>
    %36 = vector.extract_strided_slice %35 {offsets = [0, 0], sizes = [8, 64], strides = [1, 1]} : vector<8x128xf32> to vector<8x64xf32>
    %37 = vector.extract_strided_slice %35 {offsets = [0, 64], sizes = [8, 64], strides = [1, 1]} : vector<8x128xf32> to vector<8x64xf32>
    %cst_29 = arith.constant 5.000000e-01 : f32
    %38 = vector.broadcast %cst_29 : f32 to vector<8x64xf32>
    %39 = arith.mulf %38, %37 : vector<8x64xf32>
    %40 = math.exp %39 : vector<8x64xf32>
    %c0_30 = arith.constant 0 : index
    %c0_31 = arith.constant 0 : index
    %41 = vector.load %arg3[%c0_30, %c0_31] : memref<8x64xf32, #tpu.memory_space<vmem>>, vector<8x64xf32>
    %42 = arith.mulf %40, %41 : vector<8x64xf32>
    %43 = arith.addf %36, %42 : vector<8x64xf32>
    %44 = tpu.concatenate %43, %43 in 0 : vector<8x64xf32>, vector<8x64xf32> -> vector<16x64xf32>
    %45 = tpu.concatenate %22, %44 in 1 : vector<16x64xf32>, vector<16x64xf32> -> vector<16x128xf32>
    %c0_32 = arith.constant 0 : index
    %c0_33 = arith.constant 0 : index
    %46 = vector.load %arg12[%c0_32, %c0_33] : memref<128x128xf32, #tpu.memory_space<vmem>>, vector<128x128xf32>
    %cst_34 = arith.constant dense<0.000000e+00> : vector<16x128xf32>
    %47 = tpu.matmul %45, %46, %cst_34 {dimension_numbers = #tpu.dot_dimension_numbers<[1], [0], [0], [1], [0, 0, 1, 1], [], []>} : vector<16x128xf32>, vector<128x128xf32>, vector<16x128xf32> -> vector<16x128xf32>
    %c0_35 = arith.constant 0 : index
    %c0_36 = arith.constant 0 : index
    %48 = vector.load %arg13[%c0_35, %c0_36] : memref<1x128xf32, #tpu.memory_space<vmem>>, vector<1x128xf32>
    %49 = vector.broadcast %48 : vector<1x128xf32> to vector<16x128xf32>
    %50 = arith.addf %47, %49 : vector<16x128xf32>
    %cst_37 = arith.constant 0.000000e+00 : f32
    %51 = vector.broadcast %cst_37 : f32 to vector<16x128xf32>
    %52 = arith.maximumf %50, %51 : vector<16x128xf32>
    %c0_38 = arith.constant 0 : index
    %c0_39 = arith.constant 0 : index
    %53 = vector.load %arg14[%c0_38, %c0_39] : memref<128x128xf32, #tpu.memory_space<vmem>>, vector<128x128xf32>
    %cst_40 = arith.constant dense<0.000000e+00> : vector<16x128xf32>
    %54 = tpu.matmul %52, %53, %cst_40 {dimension_numbers = #tpu.dot_dimension_numbers<[1], [0], [0], [1], [0, 0, 1, 1], [], []>} : vector<16x128xf32>, vector<128x128xf32>, vector<16x128xf32> -> vector<16x128xf32>
    %c0_41 = arith.constant 0 : index
    %c0_42 = arith.constant 0 : index
    %55 = vector.load %arg15[%c0_41, %c0_42] : memref<1x128xf32, #tpu.memory_space<vmem>>, vector<1x128xf32>
    %56 = vector.broadcast %55 : vector<1x128xf32> to vector<16x128xf32>
    %57 = arith.addf %54, %56 : vector<16x128xf32>
    %c0_43 = arith.constant 0 : index
    %c0_44 = arith.constant 0 : index
    %58 = vector.load %arg16[%c0_43, %c0_44] : memref<16x128xf32, #tpu.memory_space<vmem>>, vector<16x128xf32>
    tpu.vector_store %arg16[%c0_43, %c0_44], %57 {strides = array<i32>} : memref<16x128xf32, #tpu.memory_space<vmem>>, vector<16x128xf32>,
    %c0_45 = arith.constant 0 : index
    %c0_46 = arith.constant 0 : index
    %59 = vector.load %arg17[%c0_45, %c0_46] : memref<16x128xf32, #tpu.memory_space<vmem>>, vector<16x128xf32>
    tpu.vector_store %arg17[%c0_45, %c0_46], %14 {strides = array<i32>} : memref<16x128xf32, #tpu.memory_space<vmem>>, vector<16x128xf32>,
    %c0_47 = arith.constant 0 : index
    %c0_48 = arith.constant 0 : index
    %60 = vector.load %arg18[%c0_47, %c0_48] : memref<8x128xf32, #tpu.memory_space<vmem>>, vector<8x128xf32>
    tpu.vector_store %arg18[%c0_47, %c0_48], %35 {strides = array<i32>} : memref<8x128xf32, #tpu.memory_space<vmem>>, vector<8x128xf32>,
    %c0_49 = arith.constant 0 : index
    %c0_50 = arith.constant 0 : index
    %61 = vector.load %arg19[%c0_49, %c0_50] : memref<16x64xf32, #tpu.memory_space<vmem>>, vector<16x64xf32>
    tpu.vector_store %arg19[%c0_49, %c0_50], %22 {strides = array<i32>} : memref<16x64xf32, #tpu.memory_space<vmem>>, vector<16x64xf32>,
    %c0_51 = arith.constant 0 : index
    %c0_52 = arith.constant 0 : index
    %62 = vector.load %arg20[%c0_51, %c0_52] : memref<8x64xf32, #tpu.memory_space<vmem>>, vector<8x64xf32>
    tpu.vector_store %arg20[%c0_51, %c0_52], %43 {strides = array<i32>} : memref<8x64xf32, #tpu.memory_space<vmem>>, vector<8x64xf32>,
    return
  }
}

</mosaic_0001>

<bundles_post_ra>
// kernel: tpu_custom_call.1
= control target key start
LH: loop header
LB: loop body
LE: loop exit
PB: predicated region body
PF: predicated region fallthrough
CT: control target
= control target key end

     0   :  { %s2146_s0 = inlined_call_operand.hbm [shape: f32[8,128], index: 0, kind: input, shape index: {}]   ;;  %s2147_s1 = inlined_call_operand.hbm [shape: f32[8,128], index: 1, kind: input, shape index: {}]   ;;  %s2148_s2 = inlined_call_operand.hbm [shape: f32[16,64], index: 2, kind: input, shape index: {}]   ;;  %s2149_s3 = inlined_call_operand.vmem [shape: f32[8,64], index: 3, kind: input, shape index: {}]   ;;  %s2150_s4 = inlined_call_operand.hbm [shape: f32[128,128], index: 4, kind: input, shape index: {}]   ;;  %s2151_s5 = inlined_call_operand.vmem [shape: f32[1,128], index: 5, kind: input, shape index: {}]   ;;  %s2152_s6 = inlined_call_operand.hbm [shape: f32[128,128], index: 6, kind: input, shape index: {}]   ;;  %s2153_s7 = inlined_call_operand.vmem [shape: f32[1,128], index: 7, kind: input, shape index: {}]   ;;  %s2154_s8 = inlined_call_operand.hbm [shape: f32[128,128], index: 8, kind: input, shape index: {}]   ;;  %s2155_s9 = inlined_call_operand.vmem [shape: f32[1,128], index: 9, kind: input, shape index: {}]   ;;  %s2156_s10 = inlined_call_operand.hbm [shape: f32[128,128], index: 10, kind: input, shape index: {}]   ;;  %s2157_s11 = inlined_call_operand.vmem [shape: f32[1,128], index: 11, kind: input, shape index: {}]   ;;  %s2158_s12 = inlined_call_operand.hbm [shape: f32[128,128], index: 12, kind: input, shape index: {}]   ;;  %s2159_s13 = inlined_call_operand.vmem [shape: f32[1,128], index: 13, kind: input, shape index: {}]   ;;  %s2160_s14 = inlined_call_operand.hbm [shape: f32[128,128], index: 14, kind: input, shape index: {}]   ;;  %s2161_s15 = inlined_call_operand.vmem [shape: f32[1,128], index: 15, kind: input, shape index: {}]   ;;  %s2162_s16 = inlined_call_operand.hbm [shape: f32[16,128], index: 16, kind: output, shape index: {0}]   ;;  %s2163_s17 = inlined_call_operand.hbm [shape: f32[16,128], index: 17, kind: output, shape index: {1}]   ;;  %s2164_s18 = inlined_call_operand.hbm [shape: f32[8,128], index: 18, kind: output, shape index: {2}]   ;;  %s2165_s19 = inlined_call_operand.hbm [shape: f32[16,64], index: 19, kind: output, shape index: {3}]   ;;  %s2166_s20 = inlined_call_operand.hbm [shape: f32[8,64], index: 20, kind: output, shape index: {4}]  }
   0x1   :  { %2172 = sst [smem:[#allocation32_spill]] %s2146_s0 }
   0x2   :  { %2173 = sst [smem:[#allocation33_spill]] %s2147_s1 }
   0x3   :  { %2174 = sst [smem:[#allocation34_spill]] %s2148_s2 }
   0x4   :  { %2175 = sst [smem:[#allocation35_spill]] %s2149_s3 }
   0x5   :  { %2176 = sst [smem:[#allocation36_spill]] %s2150_s4 }
   0x6   :  { %2177 = sst [smem:[#allocation37_spill]] %s2162_s16 }
   0x7   :  { %26 = vsyncpa [#allocation3], 0 }
   0x8   :  { %27 = vsyncpa [#allocation6], 0 }
   0x9   :  { %28 = vsyncpa [#allocation9], 0 }
   0xa   :  { %29 = vsyncpa [#allocation12], 0 }
   0xb   :  { %30 = vsyncpa [#allocation15], 0 }
   0xc   :  { %31 = vsyncpa [#allocation4], 0 }
   0xd   :  { %32 = vsyncpa [#allocation19], 0 }
   0xe   :  { %33 = vsyncpa [#allocation22], 0  ;;  %s1748_s1 = smov [#allocation5]   ;;  %s2178_s2 = sld [smem:[#allocation33_spill]] }
   0xf   :  { %s50_s22 = sshll.u32 %s1748_s1, 4  ;;  %s51_s22 = int_to_ptr.vmem [resolvable:$true] %s50_s22 }
  0x14   :  { %s1424_s25 = scalar_lea.hbm %s2178_s2, 128 }
  0x15   :  { %p1425_p0 = scmp.ne.s32.totalorder %s2178_s2, %s1424_s25  ;;  %p1428_p1 = scmp.lt.u32.totalorder %s1424_s25, %s2178_s2 }
  0x17   :  { %p1430_p2 = pnand %p1428_p1, %p1425_p0 }
  0x19   :  { %1433 = shalt.err (!%p1430_p2)
}
  0x1a   :  { %s1434_s4 = scalar_lea.vmem %s51_s22, 128  ;;  %p1439_p4 = scmp.lt.s32.totalorder %s51_s22, %s51_s22 }
  0x1b   :  { %p1435_p3 = scmp.ne.s32.totalorder %s51_s22, %s1434_s4  ;;  %p1440_p5 = scmp.lt.s32.totalorder %s1434_s4, %s1434_s4 }
  0x1d   :  { %p1441_p6 = por %p1440_p5, %p1439_p4 }
  0x1f   :  { %p1442_p7 = pnand %p1441_p6, %p1435_p3 }
  0x21   :  { %1445 = shalt.err (!%p1442_p7)
}
  0x22   :  { %53 = dma.hbm_to_vmem [thread:$0]  %s2178_s2, 128, %s51_s22, [#allocation6]  }
  0x23   :  { %s1749_s0 = smov [#allocation8]   ;;  %s1750_s1 = smov [#allocation11]  }
  0x24   :  { %s73_s21 = sshll.u32 %s1749_s0, 4  ;;  %s101_s23 = sshll.u32 %s1750_s1, 4  ;;  %s74_s21 = int_to_ptr.vmem [resolvable:$true] %s73_s21  ;;  %s102_s23 = int_to_ptr.vmem [resolvable:$true] %s101_s23 }
  0x25   :  { %s2179_s3 = sld [smem:[#allocation36_spill]] }
  0x2b   :  { %s1446_s26 = scalar_lea.hbm %s2179_s3, 2048 }
  0x2c   :  { %p1447_p8 = scmp.ne.s32.totalorder %s2179_s3, %s1446_s26  ;;  %p1450_p9 = scmp.lt.u32.totalorder %s1446_s26, %s2179_s3 }
  0x2e   :  { %p1452_p10 = pnand %p1450_p9, %p1447_p8 }
  0x30   :  { %1455 = shalt.err (!%p1452_p10)
}
  0x31   :  { %s1456_s22 = scalar_lea.vmem %s74_s21, 2048  ;;  %p1461_p12 = scmp.lt.s32.totalorder %s74_s21, %s74_s21 }
  0x32   :  { %p1457_p11 = scmp.ne.s32.totalorder %s74_s21, %s1456_s22  ;;  %p1462_p13 = scmp.lt.s32.totalorder %s1456_s22, %s1456_s22 }
  0x34   :  { %p1463_p0 = por %p1462_p13, %p1461_p12 }
  0x36   :  { %p1464_p1 = pnand %p1463_p0, %p1457_p11 }
  0x38   :  { %1467 = shalt.err (!%p1464_p1)
}
  0x39   :  { %s1751_s2 = smov 128   ;;  %s1752_s29 = smov 8  }
  0x3a   :  { %79 = dma.hbm_to_vmem [thread:$0]  %s2179_s3, 2048, %s74_s21, [#allocation9], %s1751_s2, %s1751_s2, %s1752_s29  }
  0x3b   :  { %s1468_s24 = scalar_lea.hbm %s2154_s8, 2048 }
  0x3c   :  { %p1469_p2 = scmp.ne.s32.totalorder %s2154_s8, %s1468_s24  ;;  %p1472_p3 = scmp.lt.u32.totalorder %s1468_s24, %s2154_s8 }
  0x3e   :  { %p1474_p4 = pnand %p1472_p3, %p1469_p2 }
  0x40   :  { %1477 = shalt.err (!%p1474_p4)
}
  0x41   :  { %s1478_s4 = scalar_lea.vmem %s102_s23, 2048  ;;  %p1483_p6 = scmp.lt.s32.totalorder %s102_s23, %s102_s23 }
  0x42   :  { %p1479_p5 = scmp.ne.s32.totalorder %s102_s23, %s1478_s4  ;;  %p1484_p7 = scmp.lt.s32.totalorder %s1478_s4, %s1478_s4 }
  0x44   :  { %p1485_p8 = por %p1484_p7, %p1483_p6 }
  0x46   :  { %p1486_p9 = pnand %p1485_p8, %p1479_p5 }
  0x48   :  { %1489 = shalt.err (!%p1486_p9)
}
  0x49   :  { %107 = dma.hbm_to_vmem [thread:$0]  %s2154_s8, 2048, %s102_s23, [#allocation12], %s1751_s2, %s1751_s2, %s1752_s29  }
  0x4a   :  { %s1753_s22 = smov [#allocation14]   ;;  %s1754_s0 = smov [#allocation2]  }
  0x4b   :  { %s129_s30 = sshll.u32 %s1753_s22, 4  ;;  %s40_s16 = sshll.u32 %s1754_s0, 4  ;;  %s130_s30 = int_to_ptr.vmem [resolvable:$true] %s129_s30  ;;  %s41_s16 = int_to_ptr.vmem [resolvable:$true] %s40_s16 }
  0x4c   :  { %s1490_s25 = scalar_lea.hbm %s2158_s12, 2048 }
  0x4d   :  { %p1491_p10 = scmp.ne.s32.totalorder %s2158_s12, %s1490_s25  ;;  %p1494_p11 = scmp.lt.u32.totalorder %s1490_s25, %s2158_s12 }
  0x4f   :  { %p1496_p12 = pnand %p1494_p11, %p1491_p10 }
  0x51   :  { %1499 = shalt.err (!%p1496_p12)
}
  0x52   :  { %s1500_s8 = scalar_lea.vmem %s130_s30, 2048  ;;  %p1505_p0 = scmp.lt.s32.totalorder %s130_s30, %s130_s30 }
  0x53   :  { %p1501_p13 = scmp.ne.s32.totalorder %s130_s30, %s1500_s8  ;;  %p1506_p1 = scmp.lt.s32.totalorder %s1500_s8, %s1500_s8 }
  0x55   :  { %p1507_p2 = por %p1506_p1, %p1505_p0 }
  0x57   :  { %p1508_p3 = pnand %p1507_p2, %p1501_p13 }
  0x59   :  { %1511 = shalt.err (!%p1508_p3)
}
  0x5a   :  { %135 = dma.hbm_to_vmem [thread:$0]  %s2158_s12, 2048, %s130_s30, [#allocation15], %s1751_s2, %s1751_s2, %s1752_s29  }
  0x5b   :  { %s2180_s0 = sld [smem:[#allocation32_spill]] }
  0x61   :  { %s1512_s1 = scalar_lea.hbm %s2180_s0, 128 }
  0x62   :  { %p1513_p4 = scmp.ne.s32.totalorder %s2180_s0, %s1512_s1  ;;  %p1516_p5 = scmp.lt.u32.totalorder %s1512_s1, %s2180_s0 }
  0x64   :  { %p1518_p6 = pnand %p1516_p5, %p1513_p4 }
  0x66   :  { %1521 = shalt.err (!%p1518_p6)
}
  0x67   :  { %s1522_s28 = scalar_lea.vmem %s41_s16, 128  ;;  %p1527_p8 = scmp.lt.s32.totalorder %s41_s16, %s41_s16 }
  0x68   :  { %p1523_p7 = scmp.ne.s32.totalorder %s41_s16, %s1522_s28  ;;  %p1528_p9 = scmp.lt.s32.totalorder %s1522_s28, %s1522_s28 }
  0x6a   :  { %p1529_p10 = por %p1528_p9, %p1527_p8 }
  0x6c   :  { %p1530_p11 = pnand %p1529_p10, %p1523_p7 }
  0x6e   :  { %1533 = shalt.err (!%p1530_p11)
}
  0x6f   :  { %43 = dma.hbm_to_vmem [thread:$0]  %s2180_s0, 128, %s41_s16, [#allocation3]  }
  0x70   :  { %s1755_s4 = smov [#allocation7]   ;;  %s1756_s23 = smov [#allocation10]  }
  0x71   :  { %s59_s8 = sshll.u32 %s1755_s4, 4  ;;  %s87_s21 = sshll.u32 %s1756_s23, 4  ;;  %s60_s8 = int_to_ptr.vmem [resolvable:$true] %s59_s8  ;;  %s88_s21 = int_to_ptr.vmem [resolvable:$true] %s87_s21 }
  0x72   :  { %s2181_s1 = sld [smem:[#allocation34_spill]] }
  0x78   :  { %s1534_s24 = scalar_lea.hbm %s2181_s1, 256 }
  0x79   :  { %p1535_p12 = scmp.ne.s32.totalorder %s2181_s1, %s1534_s24  ;;  %p1538_p13 = scmp.lt.u32.totalorder %s1534_s24, %s2181_s1 }
  0x7b   :  { %p1540_p0 = pnand %p1538_p13, %p1535_p12 }
  0x7d   :  { %1543 = shalt.err (!%p1540_p0)
}
  0x7e   :  { %s1544_s16 = scalar_lea.vmem %s60_s8, 256  ;;  %p1549_p2 = scmp.lt.s32.totalorder %s60_s8, %s60_s8 }
  0x7f   :  { %p1545_p1 = scmp.ne.s32.totalorder %s60_s8, %s1544_s16  ;;  %p1550_p3 = scmp.lt.s32.totalorder %s1544_s16, %s1544_s16 }
  0x81   :  { %p1551_p4 = por %p1550_p3, %p1549_p2 }
  0x83   :  { %p1552_p5 = pnand %p1551_p4, %p1545_p1 }
  0x85   :  { %1555 = shalt.err (!%p1552_p5)
}
  0x86   :  { %65 = dma.hbm_to_vmem [thread:$0]  %s2181_s1, 256, %s60_s8, [#allocation6], %s1751_s2, %s1751_s2, %s1752_s29  }
  0x87   :  { %s1556_s23 = scalar_lea.hbm %s2152_s6, 2048 }
  0x88   :  { %p1557_p6 = scmp.ne.s32.totalorder %s2152_s6, %s1556_s23  ;;  %p1560_p7 = scmp.lt.u32.totalorder %s1556_s23, %s2152_s6 }
  0x8a   :  { %p1562_p8 = pnand %p1560_p7, %p1557_p6 }
  0x8c   :  { %1565 = shalt.err (!%p1562_p8)
}
  0x8d   :  { %s1566_s26 = scalar_lea.vmem %s88_s21, 2048  ;;  %p1571_p10 = scmp.lt.s32.totalorder %s88_s21, %s88_s21 }
  0x8e   :  { %p1567_p9 = scmp.ne.s32.totalorder %s88_s21, %s1566_s26  ;;  %p1572_p11 = scmp.lt.s32.totalorder %s1566_s26, %s1566_s26 }
  0x90   :  { %p1573_p12 = por %p1572_p11, %p1571_p10 }
  0x92   :  { %p1574_p13 = pnand %p1573_p12, %p1567_p9 }
  0x94   :  { %1577 = shalt.err (!%p1574_p13)
}
  0x95   :  { %93 = dma.hbm_to_vmem [thread:$0]  %s2152_s6, 2048, %s88_s21, [#allocation9], %s1751_s2, %s1751_s2, %s1752_s29  }
  0x96   :  { %s1757_s27 = smov [#allocation13]   ;;  %s1758_s16 = smov [#allocation16]  }
  0x97   :  { %s115_s28 = sshll.u32 %s1757_s27, 4  ;;  %s143_s0 = sshll.u32 %s1758_s16, 4  ;;  %s116_s28 = int_to_ptr.vmem [resolvable:$true] %s115_s28  ;;  %s144_s0 = int_to_ptr.vmem [resolvable:$true] %s143_s0 }
  0x98   :  { %s1578_s4 = scalar_lea.hbm %s2156_s10, 2048 }
  0x99   :  { %p1579_p0 = scmp.ne.s32.totalorder %s2156_s10, %s1578_s4  ;;  %p1582_p1 = scmp.lt.u32.totalorder %s1578_s4, %s2156_s10 }
  0x9b   :  { %p1584_p2 = pnand %p1582_p1, %p1579_p0 }
  0x9d   :  { %1587 = shalt.err (!%p1584_p2)
}
  0x9e   :  { %s1588_s6 = scalar_lea.vmem %s116_s28, 2048  ;;  %p1593_p4 = scmp.lt.s32.totalorder %s116_s28, %s116_s28 }
  0x9f   :  { %p1589_p3 = scmp.ne.s32.totalorder %s116_s28, %s1588_s6  ;;  %p1594_p5 = scmp.lt.s32.totalorder %s1588_s6, %s1588_s6 }
  0xa1   :  { %p1595_p6 = por %p1594_p5, %p1593_p4 }
  0xa3   :  { %p1596_p7 = pnand %p1595_p6, %p1589_p3 }
  0xa5   :  { %1599 = shalt.err (!%p1596_p7)
}
  0xa6   :  { %121 = dma.hbm_to_vmem [thread:$0]  %s2156_s10, 2048, %s116_s28, [#allocation12], %s1751_s2, %s1751_s2, %s1752_s29  }
  0xa7   :  { %s1600_s1 = scalar_lea.hbm %s2160_s14, 2048 }
  0xa8   :  { %p1601_p8 = scmp.ne.s32.totalorder %s2160_s14, %s1600_s1  ;;  %p1604_p9 = scmp.lt.u32.totalorder %s1600_s1, %s2160_s14 }
  0xaa   :  { %p1606_p10 = pnand %p1604_p9, %p1601_p8 }
  0xac   :  { %1609 = shalt.err (!%p1606_p10)
}
  0xad   :  { %s1610_s4 = scalar_lea.vmem %s144_s0, 2048  ;;  %p1615_p12 = scmp.lt.s32.totalorder %s144_s0, %s144_s0 }
  0xae   :  { %p1611_p11 = scmp.ne.s32.totalorder %s144_s0, %s1610_s4  ;;  %p1616_p13 = scmp.lt.s32.totalorder %s1610_s4, %s1610_s4 }
  0xb0   :  { %p1617_p0 = por %p1616_p13, %p1615_p12 }
  0xb2   :  { %p1618_p1 = pnand %p1617_p0, %p1611_p11 }
  0xb4   :  { %1621 = shalt.err (!%p1618_p1)
}
  0xb5   :  { %149 = dma.hbm_to_vmem [thread:$0]  %s2160_s14, 2048, %s144_s0, [#allocation15], %s1751_s2, %s1751_s2, %s1752_s29  }
  0xb6   :  { %1732 = dma.done.wait [#allocation3], 128  }
  0xb7   :  { %1733 = vsyncadd [#allocation3], 4294967168 }
  0xb8   :  { %1734 = dma.done.wait [#allocation6], 384  }
  0xb9   :  { %1735 = vsyncadd [#allocation6], 4294966912 }
  0xba   :  { %1736 = dma.done.wait [#allocation9], 4096  }
  0xbb   :  { %1737 = vsyncadd [#allocation9], 4294963200 }
  0xbc   :  { %1738 = dma.done.wait [#allocation12], 4096  }
  0xbd   :  { %1739 = vsyncadd [#allocation12], 4294963200 }
  0xbe   :  { %1740 = dma.done.wait [#allocation15], 4096  }
  0xbf   :  { %1741 = vsyncadd [#allocation15], 4294963200  ;;  %v181_v0 = vld [vmem:[#allocation8] sm:$0xff]  ;;  %v182_v1 = vld [vmem:[#allocation8 + $0x8] sm:$0xff]  ;;  %v1759_v49 = vmov 0.0|0.0   ;;  %vm1760_vm0 = vmmov 0  }
  0xc0   :  { %v183_v2 = vld [vmem:[#allocation8 + $0x10] sm:$0xff]  ;;  %v1222_v3 = vpack.c.bf16 %v182_v1, %v181_v0  ;;  %v184_v4 = vld [vmem:[#allocation8 + $0x18] sm:$0xff]  ;;  %v185_v6 = vld [vmem:[#allocation8 + $0x20] sm:$0xff]  ;;  %v1761_v54 = vmov 0.0   ;;  %s2182_s23 = sld [smem:[#allocation35_spill]]  ;;  %s1762_s3 = smov 64  }
  0xc1   :  { %v1226_v5 = vpack.c.bf16 %v184_v4, %v183_v2  ;;  %v186_v7 = vld [vmem:[#allocation8 + $0x28] sm:$0xff]  ;;  %v179_v9 = vld [vmem:[#allocation2] sm:$0xff]  ;;  %v187_v10 = vld [vmem:[#allocation8 + $0x30] sm:$0xff]  ;;  %vm612_vm1 = vcmask 523264   ;;  %s1763_s8 = smov [#allocation18]   ;;  %s1764_s27 = smov [#allocation21]  }
  0xc2   :  { %1223 = vmatprep.subr.bf16.mxu0 %v1222_v3  ;;  %v1230_v8 = vpack.c.bf16 %v186_v7, %v185_v6  ;;  %v188_v11 = vld [vmem:[#allocation8 + $0x38] sm:$0xff]  ;;  %1044 = vmatprep.mubr.f32.mxu0 %v179_v9  ;;  %v189_v13 = vld [vmem:[#allocation8 + $0x40] sm:$0xff]  ;;  %v190_v14 = vld [vmem:[#allocation8 + $0x48] sm:$0xff]  ;;  %s838_s1 = sshll.u32 %s1763_s8, 4  ;;  %s860_s16 = sshll.u32 %s1764_s27, 4  ;;  %s839_s1 = int_to_ptr.vmem [resolvable:$true] %s838_s1  ;;  %s2067_s16 = int_to_ptr.vmem [resolvable:$true] %s860_s16 }
  0xc3   :  { %1225 = vmatpush3.bf16.msra.mxu0 %v1222_v3  ;;  %v1234_v12 = vpack.c.bf16 %v188_v11, %v187_v10  ;;  %v281_v15 = vld [vmem:[#allocation10] sm:$0xff]  ;;  %v282_v16 = vld [vmem:[#allocation10 + $0x8] sm:$0xff]  ;;  %v283_v18 = vld [vmem:[#allocation10 + $0x10] sm:$0xff]  ;;  %v1238_v20 = vpack.c.bf16 %v190_v14, %v189_v13  ;;  %s1622_s12 = scalar_lea.vmem %s839_s1, 256  ;;  %p1627_p3 = scmp.lt.s32.totalorder %s839_s1, %s839_s1 }
  0xc4   :  { %1227 = vmatprep.subr.bf16.mxu0 %v1226_v5  ;;  %v1254_v17 = vpack.c.bf16 %v282_v16, %v281_v15  ;;  %v284_v19 = vld [vmem:[#allocation10 + $0x18] sm:$0xff]  ;;  %v285_v22 = vld [vmem:[#allocation10 + $0x20] sm:$0xff]  ;;  %v286_v23 = vld [vmem:[#allocation10 + $0x28] sm:$0xff]  ;;  %p1623_p2 = scmp.ne.s32.totalorder %s839_s1, %s1622_s12  ;;  %p1628_p4 = scmp.lt.s32.totalorder %s1622_s12, %s1622_s12 }
  0xc5   :  { %v1258_v21 = vpack.c.bf16 %v284_v19, %v283_v18  ;;  %v191_v24 = vld [vmem:[#allocation8 + $0x50] sm:$0xff]  ;;  %v192_v25 = vld [vmem:[#allocation8 + $0x58] sm:$0xff]  ;;  %v1262_v26 = vpack.c.bf16 %v286_v23, %v285_v22  ;;  %v193_v30 = vld [vmem:[#allocation8 + $0x60] sm:$0xff] }
  0xc6   :  { %1255 = vmatprep.subr.bf16.mxu1 %v1254_v17  ;;  %v1242_v27 = vpack.c.bf16 %v192_v25, %v191_v24  ;;  %v287_v28 = vld [vmem:[#allocation10 + $0x30] sm:$0xff]  ;;  %v288_v29 = vld [vmem:[#allocation10 + $0x38] sm:$0xff]  ;;  %v194_v31 = vld [vmem:[#allocation8 + $0x68] sm:$0xff]  ;;  %p1629_p5 = por %p1628_p4, %p1627_p3 }
  0xc7   :  { %1229 = vmatpush3.bf16.msra.mxu0 %v1226_v5  ;;  %1257 = vmatpush3.bf16.msra.mxu1 %v1254_v17  ;;  %v1266_v32 = vpack.c.bf16 %v288_v29, %v287_v28  ;;  %v1246_v33 = vpack.c.bf16 %v194_v31, %v193_v30  ;;  %v289_v34 = vld [vmem:[#allocation10 + $0x40] sm:$0xff]  ;;  %v290_v35 = vld [vmem:[#allocation10 + $0x48] sm:$0xff]  ;;  %v195_v36 = vld [vmem:[#allocation8 + $0x70] sm:$0xff] }
  0xc8   :  { %1231 = vmatprep.subr.bf16.mxu0 %v1230_v8  ;;  %1259 = vmatprep.subr.bf16.mxu1 %v1258_v21  ;;  %v196_v37 = vld [vmem:[#allocation8 + $0x78] sm:$0xff]  ;;  %v1270_v38 = vpack.c.bf16 %v290_v35, %v289_v34  ;;  %v291_v40 = vld [vmem:[#allocation10 + $0x50] sm:$0xff]  ;;  %v407_v43 = vld [vmem:[#allocation11] sm:$0xff]  ;;  %p1630_p6 = pnand %p1629_p5, %p1623_p2 }
  0xc9   :  { %v1250_v39 = vpack.c.bf16 %v196_v37, %v195_v36  ;;  %v292_v41 = vld [vmem:[#allocation10 + $0x58] sm:$0xff]  ;;  %v408_v44 = vld [vmem:[#allocation11 + $0x8] sm:$0xff]  ;;  %v293_v45 = vld [vmem:[#allocation10 + $0x60] sm:$0xff] }
  0xca   :  { %v1274_v42 = vpack.c.bf16 %v292_v41, %v291_v40  ;;  %v294_v46 = vld [vmem:[#allocation10 + $0x68] sm:$0xff]  ;;  %v1287_v48 = vpack.c.bf16 %v408_v44, %v407_v43  ;;  %v409_v50 = vld [vmem:[#allocation11 + $0x10] sm:$0xff]  ;;  %v410_v51 = vld [vmem:[#allocation11 + $0x18] sm:$0xff] }
  0xcb   :  { %1233 = vmatpush3.bf16.msra.mxu0 %v1230_v8  ;;  %1261 = vmatpush3.bf16.msra.mxu1 %v1258_v21  ;;  %v180_v47 = vld [vmem:[#allocation5] sm:$0xff]  ;;  %v1278_v52 = vpack.c.bf16 %v294_v46, %v293_v45  ;;  %v1290_v53 = vpack.c.bf16 %v410_v51, %v409_v50  ;;  %v411_v55 = vld [vmem:[#allocation11 + $0x20] sm:$0xff]  ;;  %v413_v58 = vld [vmem:[#allocation11 + $0x30] sm:$0xff] }
  0xcc   :  { %1235 = vmatprep.subr.bf16.mxu0 %v1234_v12  ;;  %1263 = vmatprep.subr.bf16.mxu1 %v1262_v26  ;;  %v412_v56 = vld [vmem:[#allocation11 + $0x28] sm:$0xff]  ;;  %v414_v59 = vld [vmem:[#allocation11 + $0x38] sm:$0xff]  ;;  %v415_v61 = vld [vmem:[#allocation11 + $0x40] sm:$0xff] }
  0xcd   :  { %v1293_v57 = vpack.c.bf16 %v412_v56, %v411_v55  ;;  %v1296_v60 = vpack.c.bf16 %v414_v59, %v413_v58  ;;  %v416_v62 = vld [vmem:[#allocation11 + $0x48] sm:$0xff]  ;;  %v417_v0 = vld [vmem:[#allocation11 + $0x50] sm:$0xff]  ;;  %v418_v1 = vld [vmem:[#allocation11 + $0x58] sm:$0xff] }
  0xce   :  { %v1299_v63 = vpack.c.bf16 %v416_v62, %v415_v61  ;;  %v1302_v2 = vpack.c.bf16 %v418_v1, %v417_v0  ;;  %v419_v3 = vld [vmem:[#allocation11 + $0x60] sm:$0xff]  ;;  %v420_v4 = vld [vmem:[#allocation11 + $0x68] sm:$0xff]  ;;  %v421_v6 = vld [vmem:[#allocation11 + $0x70] sm:$0xff] }
  0xcf   :  { %1237 = vmatpush3.bf16.msra.mxu0 %v1234_v12  ;;  %1265 = vmatpush3.bf16.msra.mxu1 %v1262_v26  ;;  %v1305_v5 = vpack.c.bf16 %v420_v4, %v419_v3  ;;  %v422_v7 = vld [vmem:[#allocation11 + $0x78] sm:$0xff]  ;;  %v295_v9 = vld [vmem:[#allocation10 + $0x70] sm:$0xff]  ;;  %v597_v12 = vld [vmem:[%s2182_s23] sm:$0xff] }
  0xd0   :  { %1239 = vmatprep.subr.bf16.mxu0 %v1238_v20  ;;  %1267 = vmatprep.subr.bf16.mxu1 %v1266_v32  ;;  %v1308_v8 = vpack.c.bf16 %v422_v7, %v421_v6  ;;  %v296_v10 = vld [vmem:[#allocation10 + $0x78] sm:$0xff]  ;;  %v385_v14 = vld [vmem:[#allocation7] sm:$0xff]  ;;  %v900_v15 = vld [vmem:[%s2151_s5] ss:$0 sm:$0xff] }
  0xd1   :  { %v1282_v11 = vpack.c.bf16 %v296_v10, %v295_v9  ;;  %v386_v13 = vld [vmem:[#allocation7 + $0x8] sm:$0xff]  ;;  %599 = vrot.lane.b32.xlu0 %v597_v12, %s1762_s3  ;;  %v501_v19 = vld [vmem:[#allocation13] sm:$0xff]  ;;  %v503_v25 = vld [vmem:[#allocation13 + $0x10] sm:$0xff] }
  0xd2   :  { %391 = vrot.lane.b32.xlu1 %v386_v13, %s1762_s3  ;;  %v504_v26 = vld [vmem:[#allocation13 + $0x18] sm:$0xff]  ;;  %v505_v28 = vld [vmem:[#allocation13 + $0x20] sm:$0xff]  ;;  %v506_v29 = vld [vmem:[#allocation13 + $0x28] sm:$0xff] }
  0xd3   :  { %1241 = vmatpush3.bf16.msra.mxu0 %v1238_v20  ;;  %1269 = vmatpush3.bf16.msra.mxu1 %v1266_v32  ;;  %v502_v20 = vld [vmem:[#allocation13 + $0x8] sm:$0xff]  ;;  %v1317_v30 = vpack.c.bf16 %v506_v29, %v505_v28  ;;  %v507_v31 = vld [vmem:[#allocation13 + $0x30] sm:$0xff]  ;;  %v508_v32 = vld [vmem:[#allocation13 + $0x38] sm:$0xff] }
  0xd4   :  { %1243 = vmatprep.subr.bf16.mxu0 %v1242_v27  ;;  %1271 = vmatprep.subr.bf16.mxu1 %v1270_v38  ;;  %v1311_v23 = vpack.c.bf16 %v502_v20, %v501_v19  ;;  %v509_v34 = vld [vmem:[#allocation13 + $0x40] sm:$0xff]  ;;  %v510_v35 = vld [vmem:[#allocation13 + $0x48] sm:$0xff]  ;;  %v511_v37 = vld [vmem:[#allocation13 + $0x50] sm:$0xff] }
  0xd5   :  { %389 = vrot.lane.b32.xlu0 %v385_v14, %s1762_s3  ;;  %v1323_v36 = vpack.c.bf16 %v510_v35, %v509_v34  ;;  %v513_v40 = vld [vmem:[#allocation13 + $0x60] sm:$0xff]  ;;  %v514_v41 = vld [vmem:[#allocation13 + $0x68] sm:$0xff]  ;;  %v515_v43 = vld [vmem:[#allocation13 + $0x70] sm:$0xff] }
  0xd6   :  { %v516_v44 = vld [vmem:[#allocation13 + $0x78] sm:$0xff]  ;;  %v902_v45 = vld [vmem:[%s2155_s9] ss:$0 sm:$0xff]  ;;  %v616_v7 = vld [vmem:[#allocation14 + $0x8] sm:$0xff] }
  0xd7   :  { %1245 = vmatpush3.bf16.msra.mxu0 %v1242_v27  ;;  %1273 = vmatpush3.bf16.msra.mxu1 %v1270_v38  ;;  %v1314_v27 = vpack.c.bf16 %v504_v26, %v503_v25  ;;  %v512_v38 = vld [vmem:[#allocation13 + $0x58] sm:$0xff]  ;;  %v903_v62 = vld [vmem:[%s2157_s11] ss:$0 sm:$0xff]  ;;  %v620_v13 = vld [vmem:[#allocation14 + $0x28] sm:$0xff] }
  0xd8   :  { %1247 = vmatprep.subr.bf16.mxu0 %v1246_v33  ;;  %1275 = vmatprep.subr.bf16.mxu1 %v1274_v42  ;;  %v615_v6 = vld [vmem:[#allocation14] sm:$0xff]  ;;  %v618_v10 = vld [vmem:[#allocation14 + $0x18] sm:$0xff]  ;;  %v625_v26 = vld [vmem:[#allocation14 + $0x50] sm:$0xff] }
  0xd9   :  { %v1334_v9 = vpack.c.bf16 %v616_v7, %v615_v6  ;;  %v619_v12 = vld [vmem:[#allocation14 + $0x20] sm:$0xff] }
  0xda   :  { %v1342_v14 = vpack.c.bf16 %v620_v13, %v619_v12  ;;  %v627_v29 = vld [vmem:[#allocation14 + $0x60] sm:$0xff] }
  0xdb   :  { %1249 = vmatpush3.bf16.msra.mxu0 %v1246_v33  ;;  %1277 = vmatpush3.bf16.msra.mxu1 %v1274_v42  ;;  %v1320_v33 = vpack.c.bf16 %v508_v32, %v507_v31  ;;  %v1329_v42 = vpack.c.bf16 %v514_v41, %v513_v40  ;;  %v629_v32 = vld [vmem:[#allocation14 + $0x70] sm:$0xff]  ;;  %v718_v41 = vld [vmem:[#allocation16 + $0x18] sm:$0xff] }
  0xdc   :  { %1251 = vmatprep.subr.bf16.mxu0 %v1250_v39  ;;  %1279 = vmatprep.subr.bf16.mxu1 %v1278_v52 }
  0xdf   :  { %1253 = vmatpush3.bf16.msra.mxu0 %v1250_v39  ;;  %1281 = vmatpush3.bf16.msra.mxu1 %v1278_v52  ;;  %v1326_v39 = vpack.c.bf16 %v512_v38, %v511_v37  ;;  %v901_v52 = vld [vmem:[%s2153_s7] ss:$0 sm:$0xff]  ;;  %v716_v38 = vld [vmem:[#allocation16 + $0x8] sm:$0xff] }
  0xe0   :  { %1286 = vmatprep.subr.bf16.mxu0 %v1759_v49  ;;  %1283 = vmatprep.subr.bf16.mxu1 %v1282_v11  ;;  %v715_v37 = vld [vmem:[#allocation16] sm:$0xff] }
  0xe1   :  { %v1366_v40 = vpack.c.bf16 %v716_v38, %v715_v37 }
  0xe2   :  { %1045 = vmatmul.mubr.f32.vlgmr.msra.gmra.mrb[0].mxu0 %v180_v47 }
  0xe3   :  { %1288 = vmatpush3.bf16.msra.mxu0 %v1287_v48  ;;  %1114 = vmatprep.mubr.msk.f32.mxu0 %vm1760_vm0, %v1761_v54 }
  0xe4   :  { %1289 = vmatprep.subr.bf16.mxu0 %v1759_v49  ;;  %1285 = vmatpush3.bf16.msra.mxu1 %v1282_v11 }
  0xe5   :  { %1310 = vmatprep.subr.bf16.mxu1 %v1759_v49 }
  0xe7   :  { %1291 = vmatpush3.bf16.msra.mxu0 %v1290_v53 }
  0xe8   :  { %1292 = vmatprep.subr.bf16.mxu0 %v1759_v49 }
  0xeb   :  { %1294 = vmatpush3.bf16.msra.mxu0 %v1293_v57 }
  0xec   :  { %1295 = vmatprep.subr.bf16.mxu0 %v1759_v49 }
  0xef   :  { %1297 = vmatpush3.bf16.msra.mxu0 %v1296_v60 }
  0xf0   :  { %1298 = vmatprep.subr.bf16.mxu0 %v1759_v49 }
  0xf3   :  { %1300 = vmatpush3.bf16.msra.mxu0 %v1299_v63 }
  0xf4   :  { %1301 = vmatprep.subr.bf16.mxu0 %v1759_v49 }
  0xf7   :  { %1303 = vmatpush3.bf16.msra.mxu0 %v1302_v2 }
  0xf8   :  { %1304 = vmatprep.subr.bf16.mxu0 %v1759_v49 }
  0xfb   :  { %1306 = vmatpush3.bf16.msra.mxu0 %v1305_v5 }
  0xfc   :  { %1307 = vmatprep.subr.bf16.mxu0 %v1759_v49 }
  0xff   :  { %1309 = vmatpush3.bf16.msra.mxu0 %v1308_v8  ;;  %v617_v8 = vld [vmem:[#allocation14 + $0x10] sm:$0xff] }
 0x100   :  { %v1338_v11 = vpack.c.bf16 %v618_v10, %v617_v8  ;;  %1335 = vmatprep.subr.bf16.mxu0 %v1334_v9 }
 0x102   :  { %1115 = vmatmul.mubr.f32.vlgmr.msra.gmra.mrb[2].mxu0 %v180_v47  ;;  %v1332_v47 = vpack.c.bf16 %v516_v44, %v515_v43  ;;  %v719_v43 = vld [vmem:[#allocation16 + $0x20] sm:$0xff]  ;;  %v720_v44 = vld [vmem:[#allocation16 + $0x28] sm:$0xff] }
 0x103   :  { %1337 = vmatpush3.bf16.msra.mxu0 %v1334_v9 }
 0x104   :  { %1339 = vmatprep.subr.bf16.mxu0 %v1338_v11 }
 0x107   :  { %1341 = vmatpush3.bf16.msra.mxu0 %v1338_v11 }
 0x108   :  { %1343 = vmatprep.subr.bf16.mxu0 %v1342_v14 }
 0x10b   :  { %1345 = vmatpush3.bf16.msra.mxu0 %v1342_v14 }
 0x143   :  { %v600_v58 = vpop.permute.xlu0 %599 }
 0x144   :  { %v392_v20 = vpop.permute.xlu1 %391 }
 0x147   :  { %v390_v59 = vpop.permute.xlu0 %389 }
 0x1b5   :  { %v1046_v16 = vpop.f32.mrb[0].mxu0 }
 0x1b6   :  { %v276_v17 = vadd.f32 %v1046_v16, %v900_v15  ;;  %v270_v18 = vpop.f32.mrb[1].mxu0  ;;  %v621_v16 = vld [vmem:[#allocation14 + $0x30] sm:$0xff] }
 0x1b7   :  { %v271_v21 = vadd.f32 %v900_v15, %v270_v18 }
 0x1b8   :  { %v280_v24 = vmax.f32 %v276_v17, 0.0  ;;  %v622_v17 = vld [vmem:[#allocation14 + $0x38] sm:$0xff] }
 0x1b9   :  { %v279_v22 = vmax.f32 %v271_v21, 0.0  ;;  %v1346_v21 = vpack.c.bf16 %v622_v17, %v621_v16 }
 0x1bb   :  { %1079 = vmatprep.mubr.f32.mxu1 %v279_v22  ;;  %v623_v22 = vld [vmem:[#allocation14 + $0x40] sm:$0xff]  ;;  %1347 = vmatprep.subr.bf16.mxu0 %v1346_v21 }
 0x1bc   :  { %1080 = vmatmul.mubr.f32.vlgmr.msra.gmra.mrb[0].mxu1 %v280_v24  ;;  %1349 = vmatpush3.bf16.msra.mxu0 %v1346_v21 }
 0x1bd   :  { %1312 = vmatpush3.bf16.msra.mxu1 %v1311_v23  ;;  %1149 = vmatprep.mubr.msk.f32.mxu1 %vm1760_vm0, %v1761_v54  ;;  %v624_v23 = vld [vmem:[#allocation14 + $0x48] sm:$0xff] }
 0x1be   :  { %1313 = vmatprep.subr.bf16.mxu1 %v1759_v49  ;;  %v1350_v25 = vpack.c.bf16 %v624_v23, %v623_v22 }
 0x1c0   :  { %1351 = vmatprep.subr.bf16.mxu0 %v1350_v25 }
 0x1c1   :  { %1315 = vmatpush3.bf16.msra.mxu1 %v1314_v27  ;;  %v626_v27 = vld [vmem:[#allocation14 + $0x58] sm:$0xff]  ;;  %1353 = vmatpush3.bf16.msra.mxu0 %v1350_v25 }
 0x1c2   :  { %1316 = vmatprep.subr.bf16.mxu1 %v1759_v49  ;;  %v1354_v28 = vpack.c.bf16 %v626_v27, %v625_v26 }
 0x1c4   :  { %1355 = vmatprep.subr.bf16.mxu0 %v1354_v28 }
 0x1c5   :  { %1318 = vmatpush3.bf16.msra.mxu1 %v1317_v30  ;;  %v628_v30 = vld [vmem:[#allocation14 + $0x68] sm:$0xff]  ;;  %1357 = vmatpush3.bf16.msra.mxu0 %v1354_v28 }
 0x1c6   :  { %1319 = vmatprep.subr.bf16.mxu1 %v1759_v49  ;;  %v1358_v31 = vpack.c.bf16 %v628_v30, %v627_v29 }
 0x1c8   :  { %1359 = vmatprep.subr.bf16.mxu0 %v1358_v31 }
 0x1c9   :  { %1321 = vmatpush3.bf16.msra.mxu1 %v1320_v33  ;;  %v630_v33 = vld [vmem:[#allocation14 + $0x78] sm:$0xff]  ;;  %1361 = vmatpush3.bf16.msra.mxu0 %v1358_v31 }
 0x1ca   :  { %1322 = vmatprep.subr.bf16.mxu1 %v1759_v49  ;;  %v1362_v34 = vpack.c.bf16 %v630_v33, %v629_v32 }
 0x1cc   :  { %1363 = vmatprep.subr.bf16.mxu0 %v1362_v34 }
 0x1cd   :  { %1324 = vmatpush3.bf16.msra.mxu1 %v1323_v36  ;;  %1365 = vmatpush3.bf16.msra.mxu0 %v1362_v34 }
 0x1ce   :  { %1325 = vmatprep.subr.bf16.mxu1 %v1759_v49 }
 0x1d1   :  { %1327 = vmatpush3.bf16.msra.mxu1 %v1326_v39  ;;  %v717_v39 = vld [vmem:[#allocation16 + $0x10] sm:$0xff] }
 0x1d2   :  { %1328 = vmatprep.subr.bf16.mxu1 %v1759_v49 }
 0x1d5   :  { %1330 = vmatpush3.bf16.msra.mxu1 %v1329_v42  ;;  %v496_v46 = vpop.f32.mrb[2].mxu0  ;;  %v1370_v42 = vpack.c.bf16 %v718_v41, %v717_v39 }
 0x1d6   :  { %v497_v48 = vadd.f32 %v902_v45, %v496_v46  ;;  %v1116_v50 = vpop.f32.mrb[3].mxu0  ;;  %1331 = vmatprep.subr.bf16.mxu1 %v1759_v49  ;;  %v1374_v45 = vpack.c.bf16 %v720_v44, %v719_v43  ;;  %v721_v46 = vld [vmem:[#allocation16 + $0x30] sm:$0xff] }
 0x1d8   :  { %v500_v51 = vmax.f32 %v497_v48, 0.0 }
 0x1d9   :  { %1333 = vmatpush3.bf16.msra.mxu1 %v1332_v47  ;;  %v722_v47 = vld [vmem:[#allocation16 + $0x38] sm:$0xff] }
 0x1da   :  { %1367 = vmatprep.subr.bf16.mxu1 %v1366_v40 }
 0x1dc   :  { %1150 = vmatmul.mubr.f32.vlgmr.msra.gmra.mrb[2].mxu1 %v500_v51  ;;  %v1378_v51 = vpack.c.bf16 %v722_v47, %v721_v46 }
 0x1dd   :  { %1369 = vmatpush3.bf16.msra.mxu1 %v1366_v40 }
 0x1de   :  { %1371 = vmatprep.subr.bf16.mxu1 %v1370_v42 }
 0x1e1   :  { %1373 = vmatpush3.bf16.msra.mxu1 %v1370_v42 }
 0x1e2   :  { %1375 = vmatprep.subr.bf16.mxu1 %v1374_v45 }
 0x1e5   :  { %1377 = vmatpush3.bf16.msra.mxu1 %v1374_v45 }
 0x1e6   :  { %1379 = vmatprep.subr.bf16.mxu1 %v1378_v51 }
 0x1e9   :  { %1381 = vmatpush3.bf16.msra.mxu1 %v1378_v51 }
 0x28f   :  { %v1081_v53 = vpop.f32.mrb[0].mxu1 }
 0x290   :  { %v2037_v54 = vadd.f32 %v1081_v53, %v901_v52  ;;  %v370_v55 = vpop.f32.mrb[1].mxu1  ;;  %v724_v53 = vld [vmem:[#allocation16 + $0x48] sm:$0xff] }
 0x291   :  { %v2039_v56 = vadd.f32 %v901_v52, %v370_v55  ;;  %v723_v52 = vld [vmem:[#allocation16 + $0x40] sm:$0xff] }
 0x292   :  { %816 = vst [vmem:[#allocation18 + $0x8] sm:$0xff] %v2037_v54  ;;  %v380_v0 = vmul.f32 0.5, %v2037_v54 }
 0x293   :  { %v379_v57 = vmul.f32 0.5, %v2039_v56  ;;  %815 = vst [vmem:[#allocation18] sm:$0xff] %v2039_v56 }
 0x294   :  { %v383_v4 = vmul.f32 1.442695, %v380_v0 }
 0x295   :  { %v381_v49 = vmul.f32 1.442695, %v379_v57  ;;  %v1382_v57 = vpack.c.bf16 %v724_v53, %v723_v52 }
 0x297   :  { %1418 = vpow2.f32 %v381_v49  ;;  %v725_v49 = vld [vmem:[#allocation16 + $0x50] sm:$0xff]  ;;  %1383 = vmatprep.subr.bf16.mxu1 %v1382_v57 }
 0x298   :  { %1385 = vmatpush3.bf16.msra.mxu1 %v1382_v57 }
 0x2a1   :  { %v1419_v60 = vpop.eup %1418 }
 0x2a2   :  { %v395_v61 = vmul.f32 %v1419_v60, %v390_v59  ;;  %v727_v60 = vld [vmem:[#allocation16 + $0x60] sm:$0xff] }
 0x2a4   :  { %399 = vrot.lane.b32.xlu0 %v395_v61, %s1762_s3  ;;  %v728_v61 = vld [vmem:[#allocation16 + $0x68] sm:$0xff] }
 0x2af   :  { %v590_v63 = vpop.f32.mrb[2].mxu1 }
 0x2b0   :  { %v2049_v1 = vadd.f32 %v903_v62, %v590_v63  ;;  %v1151_v2 = vpop.f32.mrb[3].mxu1  ;;  %v1390_v62 = vpack.c.bf16 %v728_v61, %v727_v60 }
 0x2b1   :  { %v730_v2 = vld [vmem:[#allocation16 + $0x78] sm:$0xff] }
 0x2b2   :  { %v594_v3 = vmul.f32 0.5, %v2049_v1  ;;  %817 = vst [vmem:[#allocation20] sm:$0xff] %v2049_v1 }
 0x2b4   :  { %v595_v5 = vmul.f32 1.442695, %v594_v3 }
 0x2b6   :  { %1420 = vpow2.f32 %v595_v5 }
 0x2b7   :  { %1422 = vpow2.f32 %v383_v4  ;;  %v904_v4 = vld [vmem:[%s2159_s13] ss:$0 sm:$0xff] }
 0x2c0   :  { %v1421_v15 = vpop.eup %1420 }
 0x2c1   :  { %v602_v18 = vmul.f32 %v1421_v15, %v600_v58  ;;  %v1423_v19 = vpop.eup %1422  ;;  %v726_v58 = vld [vmem:[#allocation16 + $0x58] sm:$0xff] }
 0x2c2   :  { %v396_v24 = vmul.f32 %v1423_v19, %v392_v20  ;;  %v1386_v59 = vpack.c.bf16 %v726_v58, %v725_v49 }
 0x2c3   :  { %604 = vrot.lane.b32.xlu1 %v602_v18, %s1762_s3 }
 0x2c4   :  { %1387 = vmatprep.subr.bf16.mxu1 %v1386_v59 }
 0x2c5   :  { %1389 = vmatpush3.bf16.msra.mxu1 %v1386_v59 }
 0x2c6   :  { %1391 = vmatprep.subr.bf16.mxu1 %v1390_v62 }
 0x2c7   :  { %401 = vrot.lane.b32.xlu1 %v396_v24, %s1762_s3 }
 0x2c9   :  { %1393 = vmatpush3.bf16.msra.mxu1 %v1390_v62 }
 0x316   :  { %v400_v35 = vpop.permute.xlu0 %399 }
 0x317   :  { %v405_v36 = vadd.f32 %v400_v35, %v2039_v56 }
 0x319   :  { %818 = vst.msk [vmem:[#allocation21] sm:$0xff] %vm612_vm1, %v405_v36 }
 0x335   :  { %v605_v48 = vpop.permute.xlu1 %604 }
 0x336   :  { %v607_v50 = vadd.f32 %v605_v48, %v2049_v1  ;;  %v729_v1 = vld [vmem:[#allocation16 + $0x70] sm:$0xff] }
 0x337   :  { %v1394_v3 = vpack.c.bf16 %v730_v2, %v729_v1 }
 0x338   :  { %609 = vrot.lane.b32.xlu0 %v607_v50, %s1762_s3  ;;  %820 = vst.msk [vmem:[#allocation23] sm:$0xff] %vm612_vm1, %v607_v50 }
 0x339   :  { %v402_v55 = vpop.permute.xlu1 %401  ;;  %1395 = vmatprep.subr.bf16.mxu1 %v1394_v3 }
 0x33a   :  { %v406_v56 = vadd.f32 %v402_v55, %v2037_v54  ;;  %1397 = vmatpush3.bf16.msra.mxu1 %v1394_v3 }
 0x33c   :  { %819 = vst.msk [vmem:[#allocation21 + $0x8] sm:$0xff] %vm612_vm1, %v406_v56 }
 0x3aa   :  { %v610_v63 = vpop.permute.xlu0 %609 }
 0x3ab   :  { %v614_v54 = vsel %vm612_vm1, %v406_v56, %v610_v63  ;;  %v613_v0 = vsel %vm612_vm1, %v405_v36, %v610_v63 }
 0x3ac   :  { %1184 = vmatprep.mubr.f32.mxu0 %v613_v0 }
 0x3ad   :  { %1185 = vmatmul.mubr.f32.vlgmr.msra.gmra.mrb[4].mxu0 %v614_v54 }
 0x480   :  { %v1186_v5 = vpop.f32.mrb[4].mxu0 }
 0x481   :  { %v710_v6 = vadd.f32 %v1186_v5, %v904_v4  ;;  %v704_v7 = vpop.f32.mrb[5].mxu0 }
 0x482   :  { %v705_v8 = vadd.f32 %v904_v4, %v704_v7 }
 0x483   :  { %v714_v10 = vmax.f32 %v710_v6, 0.0 }
 0x484   :  { %v713_v9 = vmax.f32 %v705_v8, 0.0 }
 0x486   :  { %1219 = vmatprep.mubr.f32.mxu1 %v713_v9 }
 0x487   :  { %1220 = vmatmul.mubr.f32.vlgmr.msra.gmra.mrb[4].mxu1 %v714_v10 }
 0x488   :  { %1633 = shalt.err (!%p1630_p6)
}
 0x489   :  { %s1634_s4 = scalar_lea.hbm %s2163_s17, 256 }
 0x48a   :  { %p1635_p7 = scmp.ne.s32.totalorder %s2163_s17, %s1634_s4  ;;  %p1638_p8 = scmp.lt.u32.totalorder %s1634_s4, %s2163_s17 }
 0x48c   :  { %p1640_p9 = pnand %p1638_p8, %p1635_p7 }
 0x48e   :  { %1643 = shalt.err (!%p1640_p9)
}
 0x48f   :  { %844 = dma.vmem_to_hbm [thread:$0]  %s839_s1, 256, %s2163_s17, [#allocation19], %s1751_s2, %s1751_s2, %s1752_s29  }
 0x490   :  { %s1644_s22 = scalar_lea.vmem %s2067_s16, 256  ;;  %p1649_p11 = scmp.lt.s32.totalorder %s2067_s16, %s2067_s16 }
 0x491   :  { %p1645_p10 = scmp.ne.s32.totalorder %s2067_s16, %s1644_s22  ;;  %p1650_p12 = scmp.lt.s32.totalorder %s1644_s22, %s1644_s22 }
 0x493   :  { %p1651_p13 = por %p1650_p12, %p1649_p11 }
 0x495   :  { %p1652_p0 = pnand %p1651_p13, %p1645_p10 }
 0x497   :  { %1655 = shalt.err (!%p1652_p0)
}
 0x498   :  { %s1656_s6 = scalar_lea.hbm %s2165_s19, 256 }
 0x499   :  { %p1657_p1 = scmp.ne.s32.totalorder %s2165_s19, %s1656_s6  ;;  %p1660_p2 = scmp.lt.u32.totalorder %s1656_s6, %s2165_s19 }
 0x49b   :  { %p1662_p3 = pnand %p1660_p2, %p1657_p1 }
 0x49d   :  { %1665 = shalt.err (!%p1662_p3)
}
 0x49e   :  { %866 = dma.vmem_to_hbm [thread:$0]  %s2067_s16, 256, %s2165_s19, [#allocation22], %s1751_s2, %s1751_s2, %s1752_s29  }
 0x49f   :  { %s1765_s26 = smov [#allocation20]  }
 0x4a0   :  { %s851_s8 = sshll.u32 %s1765_s26, 4  ;;  %s852_s8 = int_to_ptr.vmem [resolvable:$true] %s851_s8 }
 0x4a1   :  { %s1666_s1 = scalar_lea.vmem %s852_s8, 128  ;;  %p1671_p5 = scmp.lt.s32.totalorder %s852_s8, %s852_s8 }
 0x4a2   :  { %p1667_p4 = scmp.ne.s32.totalorder %s852_s8, %s1666_s1  ;;  %p1672_p6 = scmp.lt.s32.totalorder %s1666_s1, %s1666_s1 }
 0x4a4   :  { %p1673_p7 = por %p1672_p6, %p1671_p5 }
 0x4a6   :  { %p1674_p8 = pnand %p1673_p7, %p1667_p4 }
 0x4a8   :  { %1677 = shalt.err (!%p1674_p8)
}
 0x4a9   :  { %s1678_s13 = scalar_lea.hbm %s2164_s18, 128 }
 0x4aa   :  { %p1679_p9 = scmp.ne.s32.totalorder %s2164_s18, %s1678_s13  ;;  %p1682_p10 = scmp.lt.u32.totalorder %s1678_s13, %s2164_s18 }
 0x4ac   :  { %p1684_p11 = pnand %p1682_p10, %p1679_p9 }
 0x4ae   :  { %1687 = shalt.err (!%p1684_p11)
}
 0x4af   :  { %854 = dma.vmem_to_hbm [thread:$0]  %s852_s8, 128, %s2164_s18, [#allocation19]  }
 0x4b0   :  { %s1766_s14 = smov [#allocation23]  }
 0x4b1   :  { %s873_s0 = sshll.u32 %s1766_s14, 4  ;;  %s874_s0 = int_to_ptr.vmem [resolvable:$true] %s873_s0 }
 0x4b2   :  { %s1688_s23 = scalar_lea.vmem %s874_s0, 128  ;;  %p1693_p13 = scmp.lt.s32.totalorder %s874_s0, %s874_s0 }
 0x4b3   :  { %p1689_p12 = scmp.ne.s32.totalorder %s874_s0, %s1688_s23  ;;  %p1694_p0 = scmp.lt.s32.totalorder %s1688_s23, %s1688_s23 }
 0x4b5   :  { %p1695_p1 = por %p1694_p0, %p1693_p13 }
 0x4b7   :  { %p1696_p2 = pnand %p1695_p1, %p1689_p12 }
 0x4b9   :  { %1699 = shalt.err (!%p1696_p2)
}
 0x4ba   :  { %s1700_s24 = scalar_lea.hbm %s2166_s20, 128 }
 0x4bb   :  { %p1701_p3 = scmp.ne.s32.totalorder %s2166_s20, %s1700_s24  ;;  %p1704_p4 = scmp.lt.u32.totalorder %s1700_s24, %s2166_s20 }
 0x4bd   :  { %p1706_p5 = pnand %p1704_p4, %p1701_p3 }
 0x4bf   :  { %1709 = shalt.err (!%p1706_p5)
}
 0x4c0   :  { %876 = dma.vmem_to_hbm [thread:$0]  %s874_s0, 128, %s2166_s20, [#allocation22]   ;;  %v905_v11 = vld [vmem:[%s2161_s15] ss:$0 sm:$0xff] }
 0x4c1   :  { %s1767_s11 = smov [#allocation17]  }
 0x4c2   :  { %s826_s26 = sshll.u32 %s1767_s11, 4  ;;  %s827_s26 = int_to_ptr.vmem [resolvable:$true] %s826_s26 }
 0x4c3   :  { %s1710_s8 = scalar_lea.vmem %s827_s26, 256  ;;  %p1715_p7 = scmp.lt.s32.totalorder %s827_s26, %s827_s26 }
 0x4c4   :  { %p1711_p6 = scmp.ne.s32.totalorder %s827_s26, %s1710_s8  ;;  %p1716_p8 = scmp.lt.s32.totalorder %s1710_s8, %s1710_s8 }
 0x4c6   :  { %p1717_p9 = por %p1716_p8, %p1715_p7 }
 0x4c8   :  { %p1718_p10 = pnand %p1717_p9, %p1711_p6 }
 0x55a   :  { %v1221_v12 = vpop.f32.mrb[4].mxu1 }
 0x55b   :  { %v810_v13 = vadd.f32 %v1221_v12, %v905_v11  ;;  %v804_v14 = vpop.f32.mrb[5].mxu1 }
 0x55c   :  { %v805_v15 = vadd.f32 %v905_v11, %v804_v14 }
 0x55d   :  { %814 = vst [vmem:[#allocation17 + $0x8] sm:$0xff] %v810_v13 }
 0x55e   :  { %813 = vst [vmem:[#allocation17] sm:$0xff] %v805_v15 }
 0x55f   :  { %1721 = shalt.err (!%p1718_p10)
}
 0x560   :  { %s2183_s27 = sld [smem:[#allocation37_spill]] }
 0x566   :  { %s1722_s15 = scalar_lea.hbm %s2183_s27, 256 }
 0x567   :  { %p1723_p11 = scmp.ne.s32.totalorder %s2183_s27, %s1722_s15  ;;  %p1726_p12 = scmp.lt.u32.totalorder %s1722_s15, %s2183_s27 }
 0x569   :  { %p1728_p13 = pnand %p1726_p12, %p1723_p11 }
 0x56b   :  { %1731 = shalt.err (!%p1728_p13)
}
 0x56c   :  { %832 = dma.vmem_to_hbm [thread:$0]  %s827_s26, 256, %s2183_s27, [#allocation4], %s1751_s2, %s1751_s2, %s1752_s29  }
 0x56d   :  { %1742 = dma.done.wait [#allocation4], 256  }
 0x56e   :  { %1743 = vsyncadd [#allocation4], 4294967040 }
 0x56f   :  { %1744 = dma.done.wait [#allocation19], 384  }
 0x570   :  { %1745 = vsyncadd [#allocation19], 4294966912 }
 0x571   :  { %1746 = dma.done.wait [#allocation22], 384  }
 0x572   :  { %1747 = vsyncadd [#allocation22], 4294966912 }
 0x573   :  { %892 = vsyncpa [#allocation3], 1 }
 0x574   :  { %893 = vsyncpa [#allocation6], 1 }
 0x575   :  { %894 = vsyncpa [#allocation9], 1 }
 0x576   :  { %895 = vsyncpa [#allocation12], 1 }
 0x577   :  { %896 = vsyncpa [#allocation15], 1 }
 0x578   :  { %897 = vsyncpa [#allocation4], 1 }
 0x579   :  { %898 = vsyncpa [#allocation19], 1 }
 0x57a   :  { %899 = vsyncpa [#allocation22], 1 }

</bundles_post_ra>
